<compile_context>
chip_gen: v5e
topology: v5e:2x2
jax: 0.10.0
libtpu: 0.0.40
codegen_flags: <defaults>
</compile_context>

<pallas_src>
import jax
import jax.numpy as jnp
from jax import lax
from jax.experimental import pallas as pl
from jax.experimental.pallas import tpu as pltpu


def _round_up(x, m):
    return (x + m - 1) // m * m


_VMEM_LIMIT = 32 * 1024 * 1024  # explicit scoped-VMEM budget, safe on v5e/v6e/v7x


# ----------------------------------------------------------------------------
# Plain-JAX glue for the data-dependent sampling / grouping of P4DConv.
# TODO(synk): FPS / ball-query are pointer-chasing gathers with no clean
# Pallas equivalent; they stay in plain JAX (deterministic, pointnet2 semantics).
# ----------------------------------------------------------------------------
def farthest_point_sample(xyz, npoint):
    """Deterministic FPS (starts at index 0, like pointnet2 CUDA FPS)."""
    B, N, _ = xyz.shape

    def body(i, carry):
        centroids, distance, farthest = carry
        centroids = centroids.at[:, i].set(farthest)
        centroid = jax.vmap(lambda p, f: p[f])(xyz, farthest)[:, None, :]  # (B,1,3)
        d = jnp.sum((xyz - centroid) ** 2, axis=-1)
        distance = jnp.minimum(distance, d)
        farthest = jnp.argmax(distance, axis=-1).astype(jnp.int32)
        return centroids, distance, farthest

    centroids = jnp.zeros((B, npoint), jnp.int32)
    distance = jnp.full((B, N), 1e10, jnp.float32)
    farthest = jnp.zeros((B,), jnp.int32)
    centroids, _, _ = jax.lax.fori_loop(0, npoint, body,
                                        (centroids, distance, farthest))
    return centroids


def ball_query(radius, nsample, xyz, new_xyz):
    """pointnet2-style ball query: first `nsample` in-radius points (original order)."""
    # TODO(synk): empty-ball fallback picks the globally closest-index point, which
    # may be outside the radius (pointnet2 leaves this case undefined).
    B, N, _ = xyz.shape
    d2 = jnp.sum((new_xyz[:, :, None, :] - xyz[:, None, :, :]) ** 2, axis=-1)  # (B,Np,N)
    ar = jnp.arange(N, dtype=jnp.int32)[None, None, :]
    in_ball = d2 <= radius * radius
    key = jnp.where(in_ball, ar, ar + N)
    order = jnp.argsort(key, axis=-1).astype(jnp.int32)
    idx = order[:, :, :nsample]
    cnt = jnp.sum(in_ball.astype(jnp.int32), axis=-1, keepdims=True)
    slot = jnp.arange(nsample, dtype=jnp.int32)[None, None, :]
    idx = jnp.where(slot < jnp.maximum(cnt, 1), idx, idx[:, :, :1])
    return idx


def group_points(points, idx):
    # points (B, N, C), idx (B, Np, S) -> (B, Np, S, C)
    return jax.vmap(lambda p, i: p[i])(points, idx)


# ----------------------------------------------------------------------------
# Pallas kernel 1: P4DConv 1x1 conv (4 -> dim) over grouped displacements
# followed by max-pool over the (temporal_kernel * nsamples) group axis.
# Token-blocked: TM tokens per grid step, lane-dense (TM, Cp) output block.
# ----------------------------------------------------------------------------
def tube_mlp_maxpool(disp, w_d, b_d):
    """disp: (M, G, 4); w_d: (4, C); b_d: (1, C).  Returns (M, Cp) features with
    the channel axis zero-padded up to a multiple of 128 (lane-dense stores)."""
    M, G, _ = disp.shape
    C = w_d.shape[1]
    Cp = _round_up(C, 128)
    w_p = jnp.zeros((4, Cp), jnp.float32).at[:, :C].set(w_d)
    b_p = jnp.zeros((1, Cp), jnp.float32).at[:, :C].set(b_d)

    # Token-block size: as large as possible while keeping the double-buffered
    # input block (lane-padded (..., 4) rows) a few MiB of VMEM.
    bytes_per_token = G * 128 * 4
    tm_cap = max(8, (4 * 1024 * 1024) // bytes_per_token) // 8 * 8
    TM = min(tm_cap, 512, _round_up(M, 8))
    Mp = _round_up(M, TM)
    if Mp != M:
        disp = jnp.concatenate(
            [disp, jnp.zeros((Mp - M, G, 4), disp.dtype)], axis=0)
    disp2d = disp.reshape(Mp * G, 4)

    def kernel(d_ref, w_ref, b_ref, o_ref):
        x = d_ref[...]                                                    # (TM*G, 4)
        feat = jnp.dot(x, w_ref[...],
                       preferred_element_type=jnp.float32)                # (TM*G, Cp)
        feat = feat.reshape(TM, G, Cp)
        # bias is group-invariant -> add after the max-pool (cheaper).
        o_ref[...] = jnp.max(feat, axis=1) + b_ref[...]                   # (TM, Cp)

    out = pl.pallas_call(
        kernel,
        out_shape=jax.ShapeDtypeStruct((Mp, Cp), jnp.float32),
        grid=(Mp // TM,),
        in_specs=[
            pl.BlockSpec((TM * G, 4), lambda i: (i, 0)),
            pl.BlockSpec((4, Cp), lambda i: (0, 0)),
            pl.BlockSpec((1, Cp), lambda i: (0, 0)),
        ],
        out_specs=pl.BlockSpec((TM, Cp), lambda i: (i, 0)),
        compiler_params=pltpu.CompilerParams(
            dimension_semantics=("parallel",)),
    )(disp2d, w_p, b_p)
    return out[:M]          # still channel-padded; sliced to C downstream


# ----------------------------------------------------------------------------
# Pallas kernel 2: pos_embedding (Conv1d k=1 on (x,y,z,t)) + feature add + ReLU.
# Flattened over B*Nv tokens, K=4 contraction done as 4 VPU broadcast-FMAs.
# ----------------------------------------------------------------------------
def pos_embed_add(xyzts_vis, feat_vis_padded, w_pos, b_pos, apply_relu):
    """xyzts_vis: (B, Nv, 4); feat_vis_padded: (B, Nv, Cp) channel-padded.
    Returns (B, Nv, C)."""
    B, Nv, _ = xyzts_vis.shape
    C = w_pos.shape[1]
    Cp = feat_vis_padded.shape[-1]
    w_p = jnp.zeros((4, Cp), jnp.float32).at[:, :C].set(w_pos)
    b_p = jnp.zeros((1, Cp), jnp.float32).at[:, :C].set(b_pos)

    R = B * Nv
    TM = min(512, _round_up(R, 8))
    Rp = _round_up(R, TM)
    xt = xyzts_vis.reshape(R, 4)
    ft = feat_vis_padded.reshape(R, Cp)
    if Rp != R:
        xt = jnp.concatenate([xt, jnp.zeros((Rp - R, 4), xt.dtype)], axis=0)
        ft = jnp.concatenate([ft, jnp.zeros((Rp - R, Cp), ft.dtype)], axis=0)

    def kernel(xt_ref, f_ref, w_ref, b_ref, o_ref):
        x = xt_ref[...]                                  # (TM, 4)
        w = w_ref[...]                                   # (4, Cp)
        # K=4 contraction as 4 VPU broadcast-FMAs (MXU would be <4% utilized).
        e = b_ref[...] + x[:, 0:1] * w[0:1, :]
        for k in range(1, 4):
            e = e + x[:, k:k + 1] * w[k:k + 1, :]
        e = e + f_ref[...]
        if apply_relu:
            e = jnp.maximum(e, 0.0)
        o_ref[...] = e                                   # (TM, Cp) lane-dense

    out = pl.pallas_call(
        kernel,
        out_shape=jax.ShapeDtypeStruct((Rp, Cp), jnp.float32),
        grid=(Rp // TM,),
        in_specs=[
            pl.BlockSpec((TM, 4), lambda i: (i, 0)),
            pl.BlockSpec((TM, Cp), lambda i: (i, 0)),
            pl.BlockSpec((4, Cp), lambda i: (0, 0)),
            pl.BlockSpec((1, Cp), lambda i: (0, 0)),
        ],
        out_specs=pl.BlockSpec((TM, Cp), lambda i: (i, 0)),
        compiler_params=pltpu.CompilerParams(
            dimension_semantics=("parallel",)),
    )(xt, ft, w_p, b_p)
    return out[:R, :C].reshape(B, Nv, C)


# ----------------------------------------------------------------------------
# Pallas kernels 3a/3b: pre-norm transformer layer split into
#   attention kernel:  x + Attn(LN1(x))   (fused QKV / output projections)
#   MLP kernel:        x + MLP(LN2(x))
# Splitting keeps the per-call VMEM weight footprint bounded (v7x: 64 MiB).
# ----------------------------------------------------------------------------
def _layernorm(v, w, b, eps=1e-5):
    mu = jnp.mean(v, axis=-1, keepdims=True)
    var = jnp.mean((v - mu) ** 2, axis=-1, keepdims=True)
    return (v - mu) * lax.rsqrt(var + eps) * w + b


def _full_spec(shape):
    return pl.BlockSpec(shape, lambda b, _n=len(shape): (0,) * _n)


def attention_block(x, p, heads, dim_head):
    B, N, D = x.shape
    Hdh = heads * dim_head

    def kernel(x_ref, ln_w, ln_b, wqkv, wo, bo, o_ref):
        xx = x_ref[0]                                                # (N, D)
        h = _layernorm(xx, ln_w[...], ln_b[...])
        # One wide QKV projection; the 1/sqrt(dh) scale is folded into the
        # Q columns of wqkv on the host.
        qkv = jnp.dot(h, wqkv[...],
                      preferred_element_type=jnp.float32)            # (N, 3*H*dh)
        q_all = qkv[:, 0:Hdh]
        k_all = qkv[:, Hdh:2 * Hdh]
        v_all = qkv[:, 2 * Hdh:3 * Hdh]
        heads_out = []
        for hd in range(heads):                                      # static unroll
            lo, hi = hd * dim_head, (hd + 1) * dim_head
            q = q_all[:, lo:hi]
            k = k_all[:, lo:hi]
            v = v_all[:, lo:hi]
            dots = lax.dot_general(q, k, (((1,), (1,)), ((), ())),
                                   preferred_element_type=jnp.float32)  # (N, N)
            dots = dots - jnp.max(dots, axis=-1, keepdims=True)
            e = jnp.exp(dots)
            attn = e * pl.reciprocal(jnp.sum(e, axis=-1, keepdims=True),
                                     approx=True)
            heads_out.append(jnp.dot(attn, v,
                                     preferred_element_type=jnp.float32))
        oh = jnp.concatenate(heads_out, axis=-1)                     # (N, H*dh)
        o_ref[0] = xx + jnp.dot(oh, wo[...],
                                preferred_element_type=jnp.float32) + bo[...]

    return pl.pallas_call(
        kernel,
        out_shape=jax.ShapeDtypeStruct((B, N, D), jnp.float32),
        grid=(B,),
        in_specs=[
            pl.BlockSpec((1, N, D), lambda b: (b, 0, 0)),
            _full_spec((1, D)), _full_spec((1, D)),
            _full_spec((D, 3 * Hdh)), _full_spec((Hdh, D)), _full_spec((1, D)),
        ],
        out_specs=pl.BlockSpec((1, N, D), lambda b: (b, 0, 0)),
        compiler_params=pltpu.CompilerParams(
            dimension_semantics=("parallel",),
            vmem_limit_bytes=_VMEM_LIMIT),
    )(x, p["ln1_w"], p["ln1_b"], p["wqkv"], p["wo"], p["bo"])


def mlp_block(x, p):
    B, N, D = x.shape
    Hm = p["w1"].shape[1]

    def kernel(x_ref, ln_w, ln_b, w1, b1, w2, b2, o_ref):
        xx = x_ref[0]                                                # (N, D)
        h = _layernorm(xx, ln_w[...], ln_b[...])
        a = jnp.dot(h, w1[...], preferred_element_type=jnp.float32) + b1[...]
        # TODO(synk): torch nn.GELU() default is the exact erf GELU; tanh approx here.
        a = 0.5 * a * (1.0 + jnp.tanh(0.7978845608028654
                                      * (a + 0.044715 * a * a * a)))
        o_ref[0] = xx + jnp.dot(a, w2[...],
                                preferred_element_type=jnp.float32) + b2[...]

    # TODO(synk): for very large mlp_dim on v7x add a K-tiling ("arbitrary")
    # grid axis over mlp_dim with a VMEM accumulator instead of full weights.
    return pl.pallas_call(
        kernel,
        out_shape=jax.ShapeDtypeStruct((B, N, D), jnp.float32),
        grid=(B,),
        in_specs=[
            pl.BlockSpec((1, N, D), lambda b: (b, 0, 0)),
            _full_spec((1, D)), _full_spec((1, D)),
            _full_spec((D, Hm)), _full_spec((1, Hm)),
            _full_spec((Hm, D)), _full_spec((1, D)),
        ],
        out_specs=pl.BlockSpec((1, N, D), lambda b: (b, 0, 0)),
        compiler_params=pltpu.CompilerParams(
            dimension_semantics=("parallel",),
            vmem_limit_bytes=_VMEM_LIMIT),
    )(x, p["ln2_w"], p["ln2_b"], p["w1"], p["b1"], p["w2"], p["b2"])


# ----------------------------------------------------------------------------
# P4DConv tube embedding = JAX grouping glue + Pallas conv/maxpool kernel.
# ----------------------------------------------------------------------------
def p4dconv_tube_embedding(pts, w_d, b_d, radius, nsamples, spatial_stride,
                           temporal_kernel_size, temporal_stride, temporal_padding):
    B, T, N, _ = pts.shape
    Np = N // spatial_stride
    # temporal 'replicate' padding [1, 0]
    frames = ([pts[:, 0]] * temporal_padding[0]
              + [pts[:, t] for t in range(T)]
              + [pts[:, T - 1]] * temporal_padding[1])
    tr = temporal_kernel_size // 2

    anchor_list, disp_list = [], []
    for t in range(tr, len(frames) - tr, temporal_stride):
        anchor_frame = frames[t]
        idx = farthest_point_sample(anchor_frame, Np)
        anchor = group_points(anchor_frame, idx[:, :, None])[:, :, 0, :]     # (B, Np, 3)
        per_t = []
        for i in range(t - tr, t + tr + 1):
            nbr = frames[i]
            nidx = ball_query(radius, nsamples, nbr, anchor)                 # (B, Np, S)
            grouped = group_points(nbr, nidx)                                # (B, Np, S, 3)
            xyz_disp = grouped - anchor[:, :, None, :]
            t_disp = jnp.full((B, Np, nsamples, 1), float(i - t), jnp.float32)
            per_t.append(jnp.concatenate([xyz_disp, t_disp], axis=-1))       # (B, Np, S, 4)
        disp_list.append(jnp.stack(per_t, axis=2))                           # (B, Np, Kt, S, 4)
        anchor_list.append(anchor)

    new_xyzs = jnp.stack(anchor_list, axis=1)                                # (B, Tp, Np, 3)
    disp = jnp.stack(disp_list, axis=1)                                      # (B, Tp, Np, Kt, S, 4)
    Tp = disp.shape[1]
    G = temporal_kernel_size * nsamples
    disp = disp.reshape(B * Tp * Np, G, 4)

    feats_p = tube_mlp_maxpool(disp, w_d, b_d)                               # (M, Cp) padded
    Cp = feats_p.shape[-1]
    feats_p = feats_p.reshape(B, Tp, Np, Cp)                                 # channel-padded
    return new_xyzs, feats_p


# ----------------------------------------------------------------------------
# Full forward (mirrors P4TransformerEncoder.forward).
# ----------------------------------------------------------------------------
def p4_transformer_encoder_forward(pts, params, *, radius, nsamples, spatial_stride,
                                   temporal_kernel_size, temporal_stride,
                                   temporal_padding, emb_relu, heads, dim_head,
                                   mask_ratio, mask_key):
    B = pts.shape[0]
    new_xyzs, feats_p = p4dconv_tube_embedding(
        pts, params["tube_w"], params["tube_b"], radius, nsamples, spatial_stride,
        temporal_kernel_size, temporal_stride, temporal_padding)
    xyz_points = new_xyzs                                    # "xyzs.copy()"
    _, Tp, Np, Cp = feats_p.shape

    # xyzt tokens: (x, y, z, t_index + 1)
    times = jnp.broadcast_to(
        (jnp.arange(Tp, dtype=jnp.float32) + 1.0)[None, :, None, None],
        (B, Tp, Np, 1))
    xyzts = jnp.concatenate([new_xyzs, times], axis=-1).reshape(B, Tp * Np, 4)
    features = feats_p.reshape(B, Tp * Np, Cp)               # channel-padded

    # random token masking.
    # TODO(synk): torch uses an in-place numpy shuffle; a fixed jax.random key
    # is used here, so visible-token selection is not bit-exact with torch.
    TN = Tp * Np
    num_mask = int(mask_ratio * TN)
    keys = jax.random.split(mask_key, B)
    perm = jax.vmap(lambda k: jax.random.permutation(k, TN))(keys)     # (B, TN)
    mask = jnp.argsort(perm, axis=-1) < num_mask                       # (B, TN) bool

    nv = TN - num_mask
    vis_idx = jnp.argsort(mask.astype(jnp.int32), axis=-1)[:, :nv]     # visible, ascending
    feature_visible = jnp.take_along_axis(features, vis_idx[:, :, None], axis=1)
    xyzts_visible = jnp.take_along_axis(xyzts, vis_idx[:, :, None], axis=1)

    # pos_embedding (Conv1d k=1) + feature add + optional ReLU  (Pallas kernel)
    x = pos_embed_add(xyzts_visible, feature_visible,
                      params["pos_w"], params["pos_b"], emb_relu)      # (B, nv, dim)

    # transformer: per layer, fused attention kernel + fused MLP kernel
    for p in params["layers"]:
        x = attention_block(x, p, heads, dim_head)
        x = mlp_block(x, p)

    return x, xyzts_visible, mask, xyz_points


# ----------------------------------------------------------------------------
# Deterministic synthetic parameter init (shapes implied by the module __init__).
# Attention weights are created pre-fused: Wqkv (D, 3*H*dh) with the 1/sqrt(dh)
# scale folded into the Q columns, Wo (H*dh, D).
# ----------------------------------------------------------------------------
def init_params(key, dim, depth, heads, dim_head, mlp_dim):
    keys = jax.random.split(key, 4 + depth)
    Hdh = heads * dim_head
    scale = float(dim_head) ** -0.5

    def nrm(k, shape):
        return 0.05 * jax.random.normal(k, shape, dtype=jnp.float32)

    params = {
        "tube_w": nrm(keys[0], (4, dim)),     # P4DConv conv_d: Conv2d(4, dim, 1)
        "tube_b": nrm(keys[1], (1, dim)),
        "pos_w": nrm(keys[2], (4, dim)),      # Conv1d(4, dim, 1)
        "pos_b": nrm(keys[3], (1, dim)),
        "layers": [],
    }
    for l in range(depth):
        lk = jax.random.split(keys[4 + l], 6)
        wqkv = nrm(lk[0], (dim, 3 * Hdh))                 # to_qkv (bias=False)
        wqkv = wqkv.at[:, :Hdh].multiply(scale)           # fold attention scale into Q
        params["layers"].append({
            "ln1_w": jnp.ones((1, dim), jnp.float32),
            "ln1_b": jnp.zeros((1, dim), jnp.float32),
            "wqkv": wqkv,
            "wo": nrm(lk[1], (Hdh, dim)),                 # to_out Linear
            "bo": jnp.zeros((1, dim), jnp.float32),
            "ln2_w": jnp.ones((1, dim), jnp.float32),
            "ln2_b": jnp.zeros((1, dim), jnp.float32),
            "w1": nrm(lk[2], (dim, mlp_dim)),
            "b1": nrm(lk[3], (1, mlp_dim)),
            "w2": nrm(lk[4], (mlp_dim, dim)),
            "b2": nrm(lk[5], (1, dim)),
        })
    return params


if __name__ == "__main__":
    # small config consistent with the module's forward
    B, T, N = 2, 4, 32
    radius, nsamples = 0.7, 8
    spatial_stride = 4
    temporal_kernel_size, temporal_stride = 3, 2
    temporal_padding = (1, 0)
    emb_relu = True
    dim, depth, heads, dim_head, mlp_dim = 32, 2, 4, 8, 64
    mask_ratio = 0.5

    root = jax.random.PRNGKey(0)
    k_pts, k_par, k_msk = jax.random.split(root, 3)
    pts = jax.random.uniform(k_pts, (B, T, N, 3), dtype=jnp.float32)  # point-cloud video

    params = init_params(k_par, dim, depth, heads, dim_head, mlp_dim)

    output, xyzts_vis, mask, xyz_points = p4_transformer_encoder_forward(
        pts, params,
        radius=radius, nsamples=nsamples, spatial_stride=spatial_stride,
        temporal_kernel_size=temporal_kernel_size, temporal_stride=temporal_stride,
        temporal_padding=temporal_padding, emb_relu=emb_relu,
        heads=heads, dim_head=dim_head, mask_ratio=mask_ratio, mask_key=k_msk)

    jax.block_until_ready((output, xyzts_vis, mask, xyz_points))

    Tp = (T + sum(temporal_padding) - temporal_kernel_size) // temporal_stride + 1
    Np = N // spatial_stride
    TN = Tp * Np
    nv = TN - int(mask_ratio * TN)
    assert output.shape == (B, nv, dim)
    assert xyzts_vis.shape == (B, nv, 4)
    assert mask.shape == (B, TN)
    assert xyz_points.shape == (B, Tp, Np, 3)
    print("KERNEL_OK")
</pallas_src>

<mosaic_0001>
module attributes {stable_mosaic.version = 11 : i64} {
  func.func @kernel(%arg0: i32, %arg1: memref<768x4xf32, #tpu.memory_space<vmem>>, %arg2: memref<4x128xf32, #tpu.memory_space<vmem>>, %arg3: memref<1x128xf32, #tpu.memory_space<vmem>>, %arg4: memref<32x128xf32, #tpu.memory_space<vmem>>) attributes {dimension_semantics = [#tpu.dimension_semantics<parallel>], iteration_bounds = array<i64: 1>, scalar_prefetch = 0 : i64, scratch_operands = 0 : i64, tpu.core_type = #tpu.core_type<tc>, window_params = [{transform_indices = @transform_0, window_bounds = array<i64: 768, 4>}, {pipeline_mode = #tpu.pipeline_mode<synchronous>, transform_indices = @transform_1, window_bounds = array<i64: 4, 128>}, {pipeline_mode = #tpu.pipeline_mode<synchronous>, transform_indices = @transform_2, window_bounds = array<i64: 1, 128>}, {transform_indices = @transform_3, window_bounds = array<i64: 32, 128>}]} {
    %c0 = arith.constant 0 : index
    %c0_0 = arith.constant 0 : index
    %0 = vector.load %arg1[%c0, %c0_0] : memref<768x4xf32, #tpu.memory_space<vmem>>, vector<768x4xf32>
    %c0_1 = arith.constant 0 : index
    %c0_2 = arith.constant 0 : index
    %1 = vector.load %arg2[%c0_1, %c0_2] : memref<4x128xf32, #tpu.memory_space<vmem>>, vector<4x128xf32>
    %cst = arith.constant dense<0.000000e+00> : vector<768x128xf32>
    %2 = tpu.matmul %0, %1, %cst {dimension_numbers = #tpu.dot_dimension_numbers<[1], [0], [0], [1], [0, 0, 1, 1], [], []>} : vector<768x4xf32>, vector<4x128xf32>, vector<768x128xf32> -> vector<768x128xf32>
    %3 = vector.shape_cast %2 : vector<768x128xf32> to vector<32x24x128xf32>
    %cst_3 = arith.constant dense<0xFF800000> : vector<32x128xf32>
    %4 = vector.multi_reduction <maximumf>, %3, %cst_3 [1] : vector<32x24x128xf32> to vector<32x128xf32>
    %c0_4 = arith.constant 0 : index
    %c0_5 = arith.constant 0 : index
    %5 = vector.load %arg3[%c0_4, %c0_5] : memref<1x128xf32, #tpu.memory_space<vmem>>, vector<1x128xf32>
    %6 = vector.broadcast %5 : vector<1x128xf32> to vector<32x128xf32>
    %7 = arith.addf %4, %6 : vector<32x128xf32>
    %c0_6 = arith.constant 0 : index
    %c0_7 = arith.constant 0 : index
    %8 = vector.load %arg4[%c0_6, %c0_7] : memref<32x128xf32, #tpu.memory_space<vmem>>, vector<32x128xf32>
    tpu.vector_store %arg4[%c0_6, %c0_7], %7 {strides = array<i32>} : memref<32x128xf32, #tpu.memory_space<vmem>>, vector<32x128xf32>,
    return
  }
  func.func @transform_0(%arg0: i32) -> (i32, i32) {
    %c0_i32 = arith.constant 0 : i32
    %c0_i32_0 = arith.constant 0 : i32
    return %arg0, %c0_i32 : i32, i32
  }
  func.func @transform_1(%arg0: i32) -> (i32, i32) {
    %c0_i32 = arith.constant 0 : i32
    %c0_i32_0 = arith.constant 0 : i32
    %c0_i32_1 = arith.constant 0 : i32
    return %c0_i32, %c0_i32_0 : i32, i32
  }
  func.func @transform_2(%arg0: i32) -> (i32, i32) {
    %c0_i32 = arith.constant 0 : i32
    %c0_i32_0 = arith.constant 0 : i32
    %c0_i32_1 = arith.constant 0 : i32
    return %c0_i32, %c0_i32_0 : i32, i32
  }
  func.func @transform_3(%arg0: i32) -> (i32, i32) {
    %c0_i32 = arith.constant 0 : i32
    %c0_i32_0 = arith.constant 0 : i32
    return %arg0, %c0_i32 : i32, i32
  }
}

</mosaic_0001>

<bundles_post_ra>
// kernel: tpu_custom_call.1
= control target key start
LH: loop header
LB: loop body
LE: loop exit
PB: predicated region body
PF: predicated region fallthrough
CT: control target
= control target key end

     0   :  { %vm401_vm0 = vcmask 1043456   ;;  %vm112_vm1 = vcmask 31744   ;;  %s1755_s0 = inlined_call_operand.vmem [shape: f32[768,4], index: 0, kind: input, shape index: {}]   ;;  %s1756_s1 = inlined_call_operand.vmem [shape: f32[4,128], index: 1, kind: input, shape index: {}]   ;;  %s1757_s2 = inlined_call_operand.vmem [shape: f32[1,128], index: 2, kind: input, shape index: {}]   ;;  %s1758_s3 = inlined_call_operand.hbm [shape: f32[32,128], index: 3, kind: output, shape index: {}]  }
   0x1   :  { %v111_v0 = vld [vmem:[%s1756_s1] sm:$0xf] }
   0x2   :  { %v15_v1 = vld [vmem:[%s1755_s0] sm:$0xff]  ;;  %1123 = vmatpush.msk.msra.mxu0 %vm401_vm0, %v111_v0  ;;  %1220 = vmatpush.msk.msra.mxu1 %vm401_vm0, %v111_v0 }
   0x3   :  { %v39_v2 = vld [vmem:[%s1755_s0 + $0xc0] sm:$0xff]  ;;  %1221 = vmatpush.msk.msra.mxu2 %vm401_vm0, %v111_v0  ;;  %1222 = vmatpush.msk.msra.mxu3 %vm401_vm0, %v111_v0 }
   0x4   :  { %v63_v3 = vld [vmem:[%s1755_s0 + $0x180] sm:$0xff]  ;;  %1124 = vmatmul.msk.f32.vlgmr.msra.gmra.mxu0 %vm112_vm1, %v15_v1  ;;  %1148 = vmatmul.msk.f32.vlgmr.msra.gmra.mxu1 %vm112_vm1, %v39_v2 }
   0x5   :  { %v87_v4 = vld [vmem:[%s1755_s0 + $0x240] sm:$0xff]  ;;  %1172 = vmatmul.msk.f32.vlgmr.msra.gmra.mxu2 %vm112_vm1, %v63_v3 }
   0x6   :  { %1196 = vmatmul.msk.f32.vlgmr.msra.gmra.mxu3 %vm112_vm1, %v87_v4 }
   0x7   :  { %8 = vsyncpa [#allocation3], 0  ;;  %v16_v5 = vld [vmem:[%s1755_s0 + $0x8] sm:$0xff]  ;;  %v17_v9 = vld [vmem:[%s1755_s0 + $0x10] sm:$0xff]  ;;  %vm1035_vm2 = vcmask 1041409   ;;  %vm1038_vm3 = vcmask 1042434  }
   0x8   :  { %v40_v6 = vld [vmem:[%s1755_s0 + $0xc8] sm:$0xff]  ;;  %v41_v10 = vld [vmem:[%s1755_s0 + $0xd0] sm:$0xff]  ;;  %v18_v13 = vld [vmem:[%s1755_s0 + $0x18] sm:$0xff]  ;;  %vm1041_vm4 = vcmask 1043459   ;;  %vm1044_vm5 = vcmask 1044484   ;;  %vm1047_vm6 = vcmask 1045509  }
   0x9   :  { %v64_v7 = vld [vmem:[%s1755_s0 + $0x188] sm:$0xff]  ;;  %v65_v11 = vld [vmem:[%s1755_s0 + $0x190] sm:$0xff]  ;;  %v42_v14 = vld [vmem:[%s1755_s0 + $0xd8] sm:$0xff]  ;;  %vm1050_vm7 = vcmask 1046534   ;;  %vm1053_vm8 = vcmask 1047559   ;;  %s1111_s14 = sshll.u32 %s1758_s3, 4  ;;  %s1112_s14 = int_to_ptr.hbm [resolvable:$true] %s1111_s14 }
   0xa   :  { %v88_v8 = vld [vmem:[%s1755_s0 + $0x248] sm:$0xff]  ;;  %v89_v12 = vld [vmem:[%s1755_s0 + $0x250] sm:$0xff]  ;;  %v66_v15 = vld [vmem:[%s1755_s0 + $0x198] sm:$0xff]  ;;  %s1254_s3 = smov 128   ;;  %s1255_s15 = smov 8  }
   0xb   :  { %v90_v16 = vld [vmem:[%s1755_s0 + $0x258] sm:$0xff]  ;;  %v19_v17 = vld [vmem:[%s1755_s0 + $0x20] sm:$0xff]  ;;  %v20_v21 = vld [vmem:[%s1755_s0 + $0x28] sm:$0xff] }
   0xc   :  { %1125 = vmatmul.msk.f32.gmra.mxu0 %vm112_vm1, %v16_v5  ;;  %1149 = vmatmul.msk.f32.gmra.mxu1 %vm112_vm1, %v40_v6  ;;  %v43_v18 = vld [vmem:[%s1755_s0 + $0xe0] sm:$0xff]  ;;  %v44_v22 = vld [vmem:[%s1755_s0 + $0xe8] sm:$0xff]  ;;  %v21_v25 = vld [vmem:[%s1755_s0 + $0x30] sm:$0xff] }
   0xd   :  { %1173 = vmatmul.msk.f32.gmra.mxu2 %vm112_vm1, %v64_v7  ;;  %v67_v19 = vld [vmem:[%s1755_s0 + $0x1a0] sm:$0xff]  ;;  %v68_v23 = vld [vmem:[%s1755_s0 + $0x1a8] sm:$0xff]  ;;  %v45_v26 = vld [vmem:[%s1755_s0 + $0xf0] sm:$0xff] }
   0xe   :  { %1197 = vmatmul.msk.f32.gmra.mxu3 %vm112_vm1, %v88_v8  ;;  %v91_v20 = vld [vmem:[%s1755_s0 + $0x260] sm:$0xff]  ;;  %v92_v24 = vld [vmem:[%s1755_s0 + $0x268] sm:$0xff]  ;;  %v69_v27 = vld [vmem:[%s1755_s0 + $0x1b0] sm:$0xff] }
   0xf   :  { %v93_v28 = vld [vmem:[%s1755_s0 + $0x270] sm:$0xff]  ;;  %v22_v29 = vld [vmem:[%s1755_s0 + $0x38] sm:$0xff]  ;;  %v23_v33 = vld [vmem:[%s1755_s0 + $0x40] sm:$0xff] }
  0x10   :  { %v46_v30 = vld [vmem:[%s1755_s0 + $0xf8] sm:$0xff]  ;;  %v47_v34 = vld [vmem:[%s1755_s0 + $0x100] sm:$0xff]  ;;  %v24_v37 = vld [vmem:[%s1755_s0 + $0x48] sm:$0xff] }
  0x11   :  { %v70_v31 = vld [vmem:[%s1755_s0 + $0x1b8] sm:$0xff]  ;;  %v71_v35 = vld [vmem:[%s1755_s0 + $0x1c0] sm:$0xff]  ;;  %v48_v38 = vld [vmem:[%s1755_s0 + $0x108] sm:$0xff] }
  0x12   :  { %v94_v32 = vld [vmem:[%s1755_s0 + $0x278] sm:$0xff]  ;;  %v95_v36 = vld [vmem:[%s1755_s0 + $0x280] sm:$0xff]  ;;  %v72_v39 = vld [vmem:[%s1755_s0 + $0x1c8] sm:$0xff] }
  0x13   :  { %v96_v40 = vld [vmem:[%s1755_s0 + $0x288] sm:$0xff]  ;;  %v25_v41 = vld [vmem:[%s1755_s0 + $0x50] sm:$0xff]  ;;  %v26_v45 = vld [vmem:[%s1755_s0 + $0x58] sm:$0xff] }
  0x14   :  { %1126 = vmatmul.msk.f32.gmra.mxu0 %vm112_vm1, %v17_v9  ;;  %1150 = vmatmul.msk.f32.gmra.mxu1 %vm112_vm1, %v41_v10  ;;  %v49_v42 = vld [vmem:[%s1755_s0 + $0x110] sm:$0xff]  ;;  %v50_v46 = vld [vmem:[%s1755_s0 + $0x118] sm:$0xff]  ;;  %v27_v49 = vld [vmem:[%s1755_s0 + $0x60] sm:$0xff] }
  0x15   :  { %1174 = vmatmul.msk.f32.gmra.mxu2 %vm112_vm1, %v65_v11  ;;  %v73_v43 = vld [vmem:[%s1755_s0 + $0x1d0] sm:$0xff]  ;;  %v74_v47 = vld [vmem:[%s1755_s0 + $0x1d8] sm:$0xff]  ;;  %v51_v50 = vld [vmem:[%s1755_s0 + $0x120] sm:$0xff] }
  0x16   :  { %1198 = vmatmul.msk.f32.gmra.mxu3 %vm112_vm1, %v89_v12  ;;  %v97_v44 = vld [vmem:[%s1755_s0 + $0x290] sm:$0xff]  ;;  %v98_v48 = vld [vmem:[%s1755_s0 + $0x298] sm:$0xff]  ;;  %v75_v51 = vld [vmem:[%s1755_s0 + $0x1e0] sm:$0xff] }
  0x17   :  { %v99_v52 = vld [vmem:[%s1755_s0 + $0x2a0] sm:$0xff]  ;;  %v28_v53 = vld [vmem:[%s1755_s0 + $0x68] sm:$0xff]  ;;  %v29_v57 = vld [vmem:[%s1755_s0 + $0x70] sm:$0xff] }
  0x18   :  { %v52_v54 = vld [vmem:[%s1755_s0 + $0x128] sm:$0xff]  ;;  %v53_v58 = vld [vmem:[%s1755_s0 + $0x130] sm:$0xff]  ;;  %v30_v61 = vld [vmem:[%s1755_s0 + $0x78] sm:$0xff] }
  0x19   :  { %v76_v55 = vld [vmem:[%s1755_s0 + $0x1e8] sm:$0xff]  ;;  %v77_v59 = vld [vmem:[%s1755_s0 + $0x1f0] sm:$0xff]  ;;  %v54_v62 = vld [vmem:[%s1755_s0 + $0x138] sm:$0xff] }
  0x1a   :  { %v100_v56 = vld [vmem:[%s1755_s0 + $0x2a8] sm:$0xff]  ;;  %v101_v60 = vld [vmem:[%s1755_s0 + $0x2b0] sm:$0xff]  ;;  %v78_v63 = vld [vmem:[%s1755_s0 + $0x1f8] sm:$0xff] }
  0x1b   :  { %v102_v0 = vld [vmem:[%s1755_s0 + $0x2b8] sm:$0xff]  ;;  %v31_v3 = vld [vmem:[%s1755_s0 + $0x80] sm:$0xff]  ;;  %v32_v11 = vld [vmem:[%s1755_s0 + $0x88] sm:$0xff] }
  0x1c   :  { %1127 = vmatmul.msk.f32.gmra.mxu0 %vm112_vm1, %v18_v13  ;;  %1151 = vmatmul.msk.f32.gmra.mxu1 %vm112_vm1, %v42_v14  ;;  %v55_v4 = vld [vmem:[%s1755_s0 + $0x140] sm:$0xff]  ;;  %v56_v12 = vld [vmem:[%s1755_s0 + $0x148] sm:$0xff] }
  0x1d   :  { %1175 = vmatmul.msk.f32.gmra.mxu2 %vm112_vm1, %v66_v15  ;;  %v79_v5 = vld [vmem:[%s1755_s0 + $0x200] sm:$0xff]  ;;  %v80_v15 = vld [vmem:[%s1755_s0 + $0x208] sm:$0xff] }
  0x1e   :  { %1199 = vmatmul.msk.f32.gmra.mxu3 %vm112_vm1, %v90_v16  ;;  %v103_v6 = vld [vmem:[%s1755_s0 + $0x2c0] sm:$0xff]  ;;  %v104_v16 = vld [vmem:[%s1755_s0 + $0x2c8] sm:$0xff] }
  0x24   :  { %1128 = vmatmul.msk.f32.gmra.mxu0 %vm112_vm1, %v19_v17  ;;  %1152 = vmatmul.msk.f32.gmra.mxu1 %vm112_vm1, %v43_v18 }
  0x25   :  { %1176 = vmatmul.msk.f32.gmra.mxu2 %vm112_vm1, %v67_v19 }
  0x26   :  { %1200 = vmatmul.msk.f32.gmra.mxu3 %vm112_vm1, %v91_v20 }
  0x2c   :  { %1129 = vmatmul.msk.f32.gmra.mxu0 %vm112_vm1, %v20_v21  ;;  %1153 = vmatmul.msk.f32.gmra.mxu1 %vm112_vm1, %v44_v22 }
  0x2d   :  { %1177 = vmatmul.msk.f32.gmra.mxu2 %vm112_vm1, %v68_v23  ;;  %v33_v23 = vld [vmem:[%s1755_s0 + $0x90] sm:$0xff] }
  0x2e   :  { %1201 = vmatmul.msk.f32.gmra.mxu3 %vm112_vm1, %v92_v24  ;;  %v57_v24 = vld [vmem:[%s1755_s0 + $0x150] sm:$0xff] }
  0x34   :  { %1130 = vmatmul.msk.f32.gmra.mxu0 %vm112_vm1, %v21_v25  ;;  %1154 = vmatmul.msk.f32.gmra.mxu1 %vm112_vm1, %v45_v26 }
  0x35   :  { %1178 = vmatmul.msk.f32.gmra.mxu2 %vm112_vm1, %v69_v27  ;;  %v81_v27 = vld [vmem:[%s1755_s0 + $0x210] sm:$0xff] }
  0x36   :  { %1202 = vmatmul.msk.f32.gmra.mxu3 %vm112_vm1, %v93_v28  ;;  %v105_v28 = vld [vmem:[%s1755_s0 + $0x2d0] sm:$0xff] }
  0x3c   :  { %1131 = vmatmul.msk.f32.gmra.mxu0 %vm112_vm1, %v22_v29  ;;  %1155 = vmatmul.msk.f32.gmra.mxu1 %vm112_vm1, %v46_v30 }
  0x3d   :  { %1179 = vmatmul.msk.f32.gmra.mxu2 %vm112_vm1, %v70_v31 }
  0x3e   :  { %1203 = vmatmul.msk.f32.gmra.mxu3 %vm112_vm1, %v94_v32 }
  0x44   :  { %1132 = vmatmul.msk.f32.gmra.mxu0 %vm112_vm1, %v23_v33  ;;  %1156 = vmatmul.msk.f32.gmra.mxu1 %vm112_vm1, %v47_v34 }
  0x45   :  { %1180 = vmatmul.msk.f32.gmra.mxu2 %vm112_vm1, %v71_v35  ;;  %v34_v35 = vld [vmem:[%s1755_s0 + $0x98] sm:$0xff] }
  0x46   :  { %1204 = vmatmul.msk.f32.gmra.mxu3 %vm112_vm1, %v95_v36  ;;  %v58_v36 = vld [vmem:[%s1755_s0 + $0x158] sm:$0xff] }
  0x4c   :  { %1133 = vmatmul.msk.f32.gmra.mxu0 %vm112_vm1, %v24_v37  ;;  %1157 = vmatmul.msk.f32.gmra.mxu1 %vm112_vm1, %v48_v38  ;;  %v82_v37 = vld [vmem:[%s1755_s0 + $0x218] sm:$0xff] }
  0x4d   :  { %1181 = vmatmul.msk.f32.gmra.mxu2 %vm112_vm1, %v72_v39  ;;  %v106_v38 = vld [vmem:[%s1755_s0 + $0x2d8] sm:$0xff] }
  0x4e   :  { %1205 = vmatmul.msk.f32.gmra.mxu3 %vm112_vm1, %v96_v40 }
  0x54   :  { %1134 = vmatmul.msk.f32.gmra.mxu0 %vm112_vm1, %v25_v41  ;;  %1158 = vmatmul.msk.f32.gmra.mxu1 %vm112_vm1, %v49_v42 }
  0x55   :  { %1182 = vmatmul.msk.f32.gmra.mxu2 %vm112_vm1, %v73_v43 }
  0x56   :  { %1206 = vmatmul.msk.f32.gmra.mxu3 %vm112_vm1, %v97_v44 }
  0x5c   :  { %1135 = vmatmul.msk.f32.gmra.mxu0 %vm112_vm1, %v26_v45  ;;  %1159 = vmatmul.msk.f32.gmra.mxu1 %vm112_vm1, %v50_v46  ;;  %v35_v45 = vld [vmem:[%s1755_s0 + $0xa0] sm:$0xff] }
  0x5d   :  { %1183 = vmatmul.msk.f32.gmra.mxu2 %vm112_vm1, %v74_v47  ;;  %v59_v46 = vld [vmem:[%s1755_s0 + $0x160] sm:$0xff] }
  0x5e   :  { %1207 = vmatmul.msk.f32.gmra.mxu3 %vm112_vm1, %v98_v48 }
  0x64   :  { %1136 = vmatmul.msk.f32.gmra.mxu0 %vm112_vm1, %v27_v49  ;;  %1160 = vmatmul.msk.f32.gmra.mxu1 %vm112_vm1, %v51_v50  ;;  %v83_v49 = vld [vmem:[%s1755_s0 + $0x220] sm:$0xff] }
  0x65   :  { %1184 = vmatmul.msk.f32.gmra.mxu2 %vm112_vm1, %v75_v51  ;;  %v107_v50 = vld [vmem:[%s1755_s0 + $0x2e0] sm:$0xff] }
  0x66   :  { %1208 = vmatmul.msk.f32.gmra.mxu3 %vm112_vm1, %v99_v52 }
  0x6c   :  { %1137 = vmatmul.msk.f32.gmra.mxu0 %vm112_vm1, %v28_v53  ;;  %1161 = vmatmul.msk.f32.gmra.mxu1 %vm112_vm1, %v52_v54 }
  0x6d   :  { %1185 = vmatmul.msk.f32.gmra.mxu2 %vm112_vm1, %v76_v55 }
  0x6e   :  { %1209 = vmatmul.msk.f32.gmra.mxu3 %vm112_vm1, %v100_v56 }
  0x74   :  { %1138 = vmatmul.msk.f32.gmra.mxu0 %vm112_vm1, %v29_v57  ;;  %1162 = vmatmul.msk.f32.gmra.mxu1 %vm112_vm1, %v53_v58 }
  0x75   :  { %1186 = vmatmul.msk.f32.gmra.mxu2 %vm112_vm1, %v77_v59 }
  0x76   :  { %1210 = vmatmul.msk.f32.gmra.mxu3 %vm112_vm1, %v101_v60 }
  0x7c   :  { %1139 = vmatmul.msk.f32.gmra.mxu0 %vm112_vm1, %v30_v61  ;;  %1163 = vmatmul.msk.f32.gmra.mxu1 %vm112_vm1, %v54_v62 }
  0x7d   :  { %1187 = vmatmul.msk.f32.gmra.mxu2 %vm112_vm1, %v78_v63  ;;  %v36_v63 = vld [vmem:[%s1755_s0 + $0xa8] sm:$0xff] }
  0x7e   :  { %1211 = vmatmul.msk.f32.gmra.mxu3 %vm112_vm1, %v102_v0  ;;  %v60_v0 = vld [vmem:[%s1755_s0 + $0x168] sm:$0xff] }
  0x81   :  { %v422_v1 = vpop.f32.mrf.mxu0  ;;  %v494_v2 = vpop.f32.mrf.mxu1 }
  0x84   :  { %1140 = vmatmul.msk.f32.gmra.mxu0 %vm112_vm1, %v31_v3  ;;  %1164 = vmatmul.msk.f32.gmra.mxu1 %vm112_vm1, %v55_v4  ;;  %v84_v3 = vld [vmem:[%s1755_s0 + $0x228] sm:$0xff] }
  0x85   :  { %1188 = vmatmul.msk.f32.gmra.mxu2 %vm112_vm1, %v79_v5  ;;  %v108_v4 = vld [vmem:[%s1755_s0 + $0x2e8] sm:$0xff] }
  0x86   :  { %1212 = vmatmul.msk.f32.gmra.mxu3 %vm112_vm1, %v103_v6 }
  0x88   :  { %v566_v7 = vpop.f32.mrf.mxu2 }
  0x89   :  { %v638_v8 = vpop.f32.mrf.mxu3  ;;  %v425_v9 = vpop.f32.mrf.mxu0 }
  0x8a   :  { %v497_v10 = vpop.f32.mrf.mxu1  ;;  %v710_v13 = vmax.f32 %v422_v1, %v425_v9 }
  0x8b   :  { %v774_v14 = vmax.f32 %v494_v2, %v497_v10 }
  0x8c   :  { %1141 = vmatmul.msk.f32.gmra.mxu0 %vm112_vm1, %v32_v11  ;;  %1165 = vmatmul.msk.f32.gmra.mxu1 %vm112_vm1, %v56_v12 }
  0x8d   :  { %1189 = vmatmul.msk.f32.gmra.mxu2 %vm112_vm1, %v80_v15 }
  0x8e   :  { %1213 = vmatmul.msk.f32.gmra.mxu3 %vm112_vm1, %v104_v16 }
  0x90   :  { %v569_v17 = vpop.f32.mrf.mxu2 }
  0x91   :  { %v641_v18 = vpop.f32.mrf.mxu3  ;;  %v838_v19 = vmax.f32 %v566_v7, %v569_v17  ;;  %v428_v21 = vpop.f32.mrf.mxu0 }
  0x92   :  { %v902_v20 = vmax.f32 %v638_v8, %v641_v18  ;;  %v500_v22 = vpop.f32.mrf.mxu1  ;;  %v711_v25 = vmax.f32 %v710_v13, %v428_v21 }
  0x93   :  { %v775_v26 = vmax.f32 %v774_v14, %v500_v22 }
  0x94   :  { %1142 = vmatmul.msk.f32.gmra.mxu0 %vm112_vm1, %v33_v23  ;;  %1166 = vmatmul.msk.f32.gmra.mxu1 %vm112_vm1, %v57_v24  ;;  %v712_v39 = vrot.slane %v711_v25, 4 }
  0x95   :  { %1190 = vmatmul.msk.f32.gmra.mxu2 %vm112_vm1, %v81_v27  ;;  %v776_v42 = vrot.slane %v775_v26, 4 }
  0x96   :  { %1214 = vmatmul.msk.f32.gmra.mxu3 %vm112_vm1, %v105_v28  ;;  %v713_v51 = vmax.f32 %v711_v25, %v712_v39  ;;  %v37_v25 = vld [vmem:[%s1755_s0 + $0xb0] sm:$0xff] }
  0x97   :  { %v777_v52 = vmax.f32 %v775_v26, %v776_v42  ;;  %v61_v26 = vld [vmem:[%s1755_s0 + $0x170] sm:$0xff] }
  0x98   :  { %v572_v29 = vpop.f32.mrf.mxu2  ;;  %v714_v54 = vrot.slane %v713_v51, 2 }
  0x99   :  { %v644_v30 = vpop.f32.mrf.mxu3  ;;  %v839_v31 = vmax.f32 %v838_v19, %v572_v29  ;;  %v431_v33 = vpop.f32.mrf.mxu0  ;;  %v778_v58 = vrot.slane %v777_v52, 2  ;;  %v85_v29 = vld [vmem:[%s1755_s0 + $0x230] sm:$0xff] }
  0x9a   :  { %v903_v32 = vmax.f32 %v902_v20, %v644_v30  ;;  %v503_v34 = vpop.f32.mrf.mxu1  ;;  %v715_v6 = vmax.f32 %v713_v51, %v714_v54  ;;  %v109_v30 = vld [vmem:[%s1755_s0 + $0x2f0] sm:$0xff] }
  0x9b   :  { %v840_v53 = vrot.slane %v839_v31, 4  ;;  %v779_v10 = vmax.f32 %v777_v52, %v778_v58  ;;  %v38_v58 = vld [vmem:[%s1755_s0 + $0xb8] sm:$0xff] }
  0x9c   :  { %1143 = vmatmul.msk.f32.gmra.mxu0 %vm112_vm1, %v34_v35  ;;  %1167 = vmatmul.msk.f32.gmra.mxu1 %vm112_vm1, %v58_v36  ;;  %v904_v55 = vrot.slane %v903_v32, 4  ;;  %v716_v14 = vrot.slane %v715_v6, 1 }
  0x9d   :  { %1191 = vmatmul.msk.f32.gmra.mxu2 %vm112_vm1, %v82_v37  ;;  %v841_v5 = vmax.f32 %v839_v31, %v840_v53  ;;  %v780_v20 = vrot.slane %v779_v10, 1 }
  0x9e   :  { %1215 = vmatmul.msk.f32.gmra.mxu3 %vm112_vm1, %v106_v38  ;;  %v905_v7 = vmax.f32 %v903_v32, %v904_v55  ;;  %v1652_v38 = vld [vmem:[%s1757_s2] ss:$0 sm:$0xff] }
  0x9f   :  { %v842_v13 = vrot.slane %v841_v5, 2  ;;  %v781_v39 = vmax.f32 %v779_v10, %v780_v20 }
  0xa0   :  { %v575_v40 = vpop.f32.mrf.mxu2  ;;  %v906_v15 = vrot.slane %v905_v7, 2 }
  0xa1   :  { %v647_v41 = vpop.f32.mrf.mxu3  ;;  %v434_v43 = vpop.f32.mrf.mxu0  ;;  %v843_v31 = vmax.f32 %v841_v5, %v842_v13  ;;  %v978_v53 = vadd.f32 %v1652_v38, %v781_v39 }
  0xa2   :  { %v506_v44 = vpop.f32.mrf.mxu1  ;;  %v718_v47 = vmax.f32 %v431_v33, %v434_v43  ;;  %v907_v35 = vmax.f32 %v905_v7, %v906_v15 }
  0xa3   :  { %v782_v48 = vmax.f32 %v503_v34, %v506_v44  ;;  %v717_v34 = vmax.f32 %v715_v6, %v716_v14  ;;  %v844_v44 = vrot.slane %v843_v31, 1 }
  0xa4   :  { %1144 = vmatmul.msk.f32.gmra.mxu0 %vm112_vm1, %v35_v45  ;;  %1168 = vmatmul.msk.f32.gmra.mxu1 %vm112_vm1, %v59_v46 }
  0xa5   :  { %1192 = vmatmul.msk.f32.gmra.mxu2 %vm112_vm1, %v83_v49  ;;  %v970_v52 = vadd.f32 %v1652_v38, %v717_v34 }
  0xa6   :  { %1216 = vmatmul.msk.f32.gmra.mxu3 %vm112_vm1, %v107_v50 }
  0xa8   :  { %v578_v56 = vpop.f32.mrf.mxu2 }
  0xa9   :  { %v650_v57 = vpop.f32.mrf.mxu3  ;;  %v846_v59 = vmax.f32 %v575_v40, %v578_v56  ;;  %v437_v61 = vpop.f32.mrf.mxu0 }
  0xaa   :  { %v910_v60 = vmax.f32 %v647_v41, %v650_v57  ;;  %v509_v62 = vpop.f32.mrf.mxu1  ;;  %v719_v1 = vmax.f32 %v718_v47, %v437_v61  ;;  %v908_v47 = vrot.slane %v907_v35, 1 }
  0xab   :  { %v783_v2 = vmax.f32 %v782_v48, %v509_v62 }
  0xac   :  { %v720_v8 = vrot.slane %v719_v1, 4  ;;  %1145 = vmatmul.msk.f32.gmra.mxu0 %vm112_vm1, %v36_v63  ;;  %1169 = vmatmul.msk.f32.gmra.mxu1 %vm112_vm1, %v60_v0  ;;  %v86_v0 = vld [vmem:[%s1755_s0 + $0x238] sm:$0xff]  ;;  %v909_v5 = vmax.f32 %v907_v35, %v908_v47 }
  0xad   :  { %v784_v9 = vrot.slane %v783_v2, 4  ;;  %1193 = vmatmul.msk.f32.gmra.mxu2 %vm112_vm1, %v84_v3 }
  0xae   :  { %1217 = vmatmul.msk.f32.gmra.mxu3 %vm112_vm1, %v108_v4  ;;  %v721_v11 = vmax.f32 %v719_v1, %v720_v8  ;;  %v110_v1 = vld [vmem:[%s1755_s0 + $0x2f8] sm:$0xff]  ;;  %v994_v13 = vadd.f32 %v1652_v38, %v909_v5 }
  0xaf   :  { %v785_v12 = vmax.f32 %v783_v2, %v784_v9  ;;  %v845_v2 = vmax.f32 %v843_v31, %v844_v44 }
  0xb0   :  { %v722_v16 = vrot.slane %v721_v11, 2  ;;  %v581_v18 = vpop.f32.mrf.mxu2 }
  0xb1   :  { %v786_v17 = vrot.slane %v785_v12, 2  ;;  %v653_v19 = vpop.f32.mrf.mxu3  ;;  %v847_v21 = vmax.f32 %v846_v59, %v581_v18  ;;  %v1631_v23 = vpop.f32.mrf.mxu0  ;;  %v62_v59 = vld [vmem:[%s1755_s0 + $0x178] sm:$0xff]  ;;  %s1253_s0 = smov [#allocation2]  }
  0xb2   :  { %v911_v22 = vmax.f32 %v910_v60, %v653_v19  ;;  %v1633_v24 = vpop.f32.mrf.mxu1  ;;  %v723_v27 = vmax.f32 %v721_v11, %v722_v16  ;;  %s1109_s11 = sshll.u32 %s1253_s0, 4  ;;  %s1110_s11 = int_to_ptr.vmem [resolvable:$true] %s1109_s11 }
  0xb3   :  { %v787_v28 = vmax.f32 %v785_v12, %v786_v17  ;;  %v848_v32 = vrot.slane %v847_v21, 4  ;;  %v986_v12 = vadd.f32 %v1652_v38, %v845_v2 }
  0xb4   :  { %v912_v33 = vrot.slane %v911_v22, 4  ;;  %v724_v36 = vrot.slane %v723_v27, 1  ;;  %1146 = vmatmul.msk.f32.gmra.mxu0 %vm112_vm1, %v37_v25  ;;  %1170 = vmatmul.msk.f32.gmra.mxu1 %vm112_vm1, %v61_v26 }
  0xb5   :  { %v788_v37 = vrot.slane %v787_v28, 1  ;;  %v849_v40 = vmax.f32 %v847_v21, %v848_v32  ;;  %1194 = vmatmul.msk.f32.gmra.mxu2 %vm112_vm1, %v85_v29 }
  0xb6   :  { %v913_v41 = vmax.f32 %v911_v22, %v912_v33  ;;  %1218 = vmatmul.msk.f32.gmra.mxu3 %vm112_vm1, %v109_v30  ;;  %v725_v42 = vmax.f32 %v723_v27, %v724_v36 }
  0xb7   :  { %v789_v43 = vmax.f32 %v787_v28, %v788_v37  ;;  %v850_v45 = vrot.slane %v849_v40, 2 }
  0xb8   :  { %v914_v46 = vrot.slane %v913_v41, 2  ;;  %v971_v48 = vadd.f32 %v1652_v38, %v725_v42  ;;  %v584_v50 = vpop.f32.mrf.mxu2 }
  0xb9   :  { %v979_v49 = vadd.f32 %v1652_v38, %v789_v43  ;;  %v656_v51 = vpop.f32.mrf.mxu3  ;;  %v851_v54 = vmax.f32 %v849_v40, %v850_v45  ;;  %v443_v56 = vpop.f32.mrf.mxu0 }
  0xba   :  { %v915_v55 = vmax.f32 %v913_v41, %v914_v46  ;;  %v515_v57 = vpop.f32.mrf.mxu1  ;;  %v1034_v60 = vrot.slane %v971_v48, 7  ;;  %v726_v62 = vmax.f32 %v1631_v23, %v443_v56 }
  0xbb   :  { %v1055_v61 = vrot.slane %v979_v49, 7  ;;  %v790_v63 = vmax.f32 %v1633_v24, %v515_v57  ;;  %v852_v3 = vrot.slane %v851_v54, 1 }
  0xbc   :  { %v916_v4 = vrot.slane %v915_v55, 1  ;;  %v1675_v6 = vsel %vm1035_vm2, %v1034_v60, %v970_v52  ;;  %1147 = vmatmul.msk.f32.gmra.mxu0 %vm112_vm1, %v38_v58  ;;  %1171 = vmatmul.msk.f32.gmra.mxu1 %vm112_vm1, %v62_v59 }
  0xbd   :  { %v1678_v7 = vsel %vm1035_vm2, %v1055_v61, %v978_v53  ;;  %v853_v8 = vmax.f32 %v851_v54, %v852_v3  ;;  %1195 = vmatmul.msk.f32.gmra.mxu2 %vm112_vm1, %v86_v0 }
  0xbe   :  { %v917_v9 = vmax.f32 %v915_v55, %v916_v4  ;;  %1219 = vmatmul.msk.f32.gmra.mxu3 %vm112_vm1, %v110_v1 }
  0xbf   :  { %v987_v10 = vadd.f32 %v1652_v38, %v853_v8 }
  0xc0   :  { %v995_v11 = vadd.f32 %v1652_v38, %v917_v9  ;;  %v587_v14 = vpop.f32.mrf.mxu2 }
  0xc1   :  { %v659_v15 = vpop.f32.mrf.mxu3  ;;  %v1069_v16 = vrot.slane %v987_v10, 7  ;;  %v854_v18 = vmax.f32 %v584_v50, %v587_v14  ;;  %v446_v20 = vpop.f32.mrf.mxu0 }
  0xc2   :  { %v1083_v17 = vrot.slane %v995_v11, 7  ;;  %v918_v19 = vmax.f32 %v656_v51, %v659_v15  ;;  %v518_v21 = vpop.f32.mrf.mxu1  ;;  %v727_v22 = vmax.f32 %v726_v62, %v446_v20 }
  0xc3   :  { %v791_v23 = vmax.f32 %v790_v63, %v518_v21  ;;  %v1070_v24 = vsel %vm1035_vm2, %v1069_v16, %v986_v12 }
  0xc4   :  { %v1084_v25 = vsel %vm1035_vm2, %v1083_v17, %v994_v13  ;;  %v728_v26 = vrot.slane %v727_v22, 4 }
  0xc5   :  { %v792_v27 = vrot.slane %v791_v23, 4 }
  0xc6   :  { %v729_v28 = vmax.f32 %v727_v22, %v728_v26 }
  0xc7   :  { %v793_v29 = vmax.f32 %v791_v23, %v792_v27 }
  0xc8   :  { %v730_v30 = vrot.slane %v729_v28, 2  ;;  %v590_v32 = vpop.f32.mrf.mxu2 }
  0xc9   :  { %v794_v31 = vrot.slane %v793_v29, 2  ;;  %v662_v33 = vpop.f32.mrf.mxu3  ;;  %v855_v34 = vmax.f32 %v854_v18, %v590_v32  ;;  %v449_v36 = vpop.f32.mrf.mxu0 }
  0xca   :  { %v919_v35 = vmax.f32 %v918_v19, %v662_v33  ;;  %v521_v37 = vpop.f32.mrf.mxu1  ;;  %v731_v39 = vmax.f32 %v729_v28, %v730_v30 }
  0xcb   :  { %v795_v40 = vmax.f32 %v793_v29, %v794_v31  ;;  %v856_v41 = vrot.slane %v855_v34, 4 }
  0xcc   :  { %v920_v42 = vrot.slane %v919_v35, 4  ;;  %v732_v43 = vrot.slane %v731_v39, 1 }
  0xcd   :  { %v796_v44 = vrot.slane %v795_v40, 1  ;;  %v857_v45 = vmax.f32 %v855_v34, %v856_v41 }
  0xce   :  { %v921_v46 = vmax.f32 %v919_v35, %v920_v42  ;;  %v733_v47 = vmax.f32 %v731_v39, %v732_v43 }
  0xcf   :  { %v797_v48 = vmax.f32 %v795_v40, %v796_v44  ;;  %v858_v49 = vrot.slane %v857_v45, 2 }
  0xd0   :  { %v922_v50 = vrot.slane %v921_v46, 2  ;;  %v972_v51 = vadd.f32 %v1652_v38, %v733_v47  ;;  %v593_v53 = vpop.f32.mrf.mxu2 }
  0xd1   :  { %v980_v52 = vadd.f32 %v1652_v38, %v797_v48  ;;  %v665_v54 = vpop.f32.mrf.mxu3  ;;  %v859_v55 = vmax.f32 %v857_v45, %v858_v49  ;;  %v452_v57 = vpop.f32.mrf.mxu0 }
  0xd2   :  { %v923_v56 = vmax.f32 %v921_v46, %v922_v50  ;;  %v524_v58 = vpop.f32.mrf.mxu1  ;;  %v1037_v59 = vrot.slane %v972_v51, 6  ;;  %v734_v61 = vmax.f32 %v449_v36, %v452_v57 }
  0xd3   :  { %v1057_v60 = vrot.slane %v980_v52, 6  ;;  %v798_v62 = vmax.f32 %v521_v37, %v524_v58  ;;  %v860_v63 = vrot.slane %v859_v55, 1 }
  0xd4   :  { %v924_v0 = vrot.slane %v923_v56, 1  ;;  %v1039_v1 = vsel %vm1038_vm3, %v1037_v59, %v1675_v6 }
  0xd5   :  { %v1058_v2 = vsel %vm1038_vm3, %v1057_v60, %v1678_v7  ;;  %v861_v3 = vmax.f32 %v859_v55, %v860_v63 }
  0xd6   :  { %v925_v4 = vmax.f32 %v923_v56, %v924_v0 }
  0xd7   :  { %v988_v5 = vadd.f32 %v1652_v38, %v861_v3 }
  0xd8   :  { %v996_v8 = vadd.f32 %v1652_v38, %v925_v4  ;;  %v596_v9 = vpop.f32.mrf.mxu2 }
  0xd9   :  { %v668_v10 = vpop.f32.mrf.mxu3  ;;  %v1071_v11 = vrot.slane %v988_v5, 6  ;;  %v862_v13 = vmax.f32 %v593_v53, %v596_v9  ;;  %v455_v15 = vpop.f32.mrf.mxu0 }
  0xda   :  { %v1085_v12 = vrot.slane %v996_v8, 6  ;;  %v926_v14 = vmax.f32 %v665_v54, %v668_v10  ;;  %v527_v16 = vpop.f32.mrf.mxu1  ;;  %v735_v17 = vmax.f32 %v734_v61, %v455_v15 }
  0xdb   :  { %v799_v18 = vmax.f32 %v798_v62, %v527_v16  ;;  %v1072_v6 = vsel %vm1038_vm3, %v1071_v11, %v1070_v24 }
  0xdc   :  { %v1086_v7 = vsel %vm1038_vm3, %v1085_v12, %v1084_v25  ;;  %v736_v19 = vrot.slane %v735_v17, 4 }
  0xdd   :  { %v800_v20 = vrot.slane %v799_v18, 4 }
  0xde   :  { %v737_v21 = vmax.f32 %v735_v17, %v736_v19 }
  0xdf   :  { %v801_v22 = vmax.f32 %v799_v18, %v800_v20 }
  0xe0   :  { %v738_v23 = vrot.slane %v737_v21, 2  ;;  %v599_v27 = vpop.f32.mrf.mxu2 }
  0xe1   :  { %v802_v26 = vrot.slane %v801_v22, 2  ;;  %v671_v28 = vpop.f32.mrf.mxu3  ;;  %v863_v29 = vmax.f32 %v862_v13, %v599_v27  ;;  %v458_v31 = vpop.f32.mrf.mxu0 }
  0xe2   :  { %v927_v30 = vmax.f32 %v926_v14, %v671_v28  ;;  %v530_v32 = vpop.f32.mrf.mxu1  ;;  %v739_v33 = vmax.f32 %v737_v21, %v738_v23 }
  0xe3   :  { %v803_v34 = vmax.f32 %v801_v22, %v802_v26  ;;  %v864_v35 = vrot.slane %v863_v29, 4 }
  0xe4   :  { %v928_v36 = vrot.slane %v927_v30, 4  ;;  %v740_v37 = vrot.slane %v739_v33, 1 }
  0xe5   :  { %v804_v24 = vrot.slane %v803_v34, 1  ;;  %v865_v39 = vmax.f32 %v863_v29, %v864_v35 }
  0xe6   :  { %v929_v25 = vmax.f32 %v927_v30, %v928_v36  ;;  %v741_v40 = vmax.f32 %v739_v33, %v740_v37 }
  0xe7   :  { %v805_v41 = vmax.f32 %v803_v34, %v804_v24  ;;  %v866_v42 = vrot.slane %v865_v39, 2 }
  0xe8   :  { %v930_v43 = vrot.slane %v929_v25, 2  ;;  %v973_v44 = vadd.f32 %v1652_v38, %v741_v40  ;;  %v602_v46 = vpop.f32.mrf.mxu2 }
  0xe9   :  { %v981_v45 = vadd.f32 %v1652_v38, %v805_v41  ;;  %v674_v47 = vpop.f32.mrf.mxu3  ;;  %v867_v48 = vmax.f32 %v865_v39, %v866_v42  ;;  %v461_v50 = vpop.f32.mrf.mxu0 }
  0xea   :  { %v931_v49 = vmax.f32 %v929_v25, %v930_v43  ;;  %v533_v51 = vpop.f32.mrf.mxu1  ;;  %v1040_v52 = vrot.slane %v973_v44, 5  ;;  %v742_v54 = vmax.f32 %v458_v31, %v461_v50 }
  0xeb   :  { %v1059_v53 = vrot.slane %v981_v45, 5  ;;  %v806_v55 = vmax.f32 %v530_v32, %v533_v51  ;;  %v868_v56 = vrot.slane %v867_v48, 1 }
  0xec   :  { %v932_v57 = vrot.slane %v931_v49, 1  ;;  %v1042_v58 = vsel %vm1041_vm4, %v1040_v52, %v1039_v1 }
  0xed   :  { %v1060_v59 = vsel %vm1041_vm4, %v1059_v53, %v1058_v2  ;;  %v869_v60 = vmax.f32 %v867_v48, %v868_v56 }
  0xee   :  { %v933_v61 = vmax.f32 %v931_v49, %v932_v57 }
  0xef   :  { %v989_v62 = vadd.f32 %v1652_v38, %v869_v60 }
  0xf0   :  { %v997_v63 = vadd.f32 %v1652_v38, %v933_v61  ;;  %v605_v0 = vpop.f32.mrf.mxu2 }
  0xf1   :  { %v677_v3 = vpop.f32.mrf.mxu3  ;;  %v1073_v4 = vrot.slane %v989_v62, 5  ;;  %v870_v8 = vmax.f32 %v602_v46, %v605_v0  ;;  %v464_v10 = vpop.f32.mrf.mxu0 }
  0xf2   :  { %v1087_v5 = vrot.slane %v997_v63, 5  ;;  %v934_v9 = vmax.f32 %v674_v47, %v677_v3  ;;  %v536_v11 = vpop.f32.mrf.mxu1  ;;  %v743_v12 = vmax.f32 %v742_v54, %v464_v10 }
  0xf3   :  { %v807_v13 = vmax.f32 %v806_v55, %v536_v11  ;;  %v1074_v1 = vsel %vm1041_vm4, %v1073_v4, %v1072_v6 }
  0xf4   :  { %v1088_v2 = vsel %vm1041_vm4, %v1087_v5, %v1086_v7  ;;  %v744_v14 = vrot.slane %v743_v12, 4 }
  0xf5   :  { %v808_v15 = vrot.slane %v807_v13, 4 }
  0xf6   :  { %v745_v16 = vmax.f32 %v743_v12, %v744_v14 }
  0xf7   :  { %v809_v17 = vmax.f32 %v807_v13, %v808_v15 }
  0xf8   :  { %v746_v18 = vrot.slane %v745_v16, 2  ;;  %v608_v20 = vpop.f32.mrf.mxu2 }
  0xf9   :  { %v810_v19 = vrot.slane %v809_v17, 2  ;;  %v680_v21 = vpop.f32.mrf.mxu3  ;;  %v871_v22 = vmax.f32 %v870_v8, %v608_v20  ;;  %v467_v26 = vpop.f32.mrf.mxu0 }
  0xfa   :  { %v935_v23 = vmax.f32 %v934_v9, %v680_v21  ;;  %v539_v27 = vpop.f32.mrf.mxu1  ;;  %v747_v28 = vmax.f32 %v745_v16, %v746_v18 }
  0xfb   :  { %v811_v29 = vmax.f32 %v809_v17, %v810_v19  ;;  %v872_v30 = vrot.slane %v871_v22, 4 }
  0xfc   :  { %v936_v31 = vrot.slane %v935_v23, 4  ;;  %v748_v32 = vrot.slane %v747_v28, 1 }
  0xfd   :  { %v812_v6 = vrot.slane %v811_v29, 1  ;;  %v873_v33 = vmax.f32 %v871_v22, %v872_v30 }
  0xfe   :  { %v937_v7 = vmax.f32 %v935_v23, %v936_v31  ;;  %v749_v34 = vmax.f32 %v747_v28, %v748_v32 }
  0xff   :  { %v813_v35 = vmax.f32 %v811_v29, %v812_v6  ;;  %v874_v36 = vrot.slane %v873_v33, 2 }
 0x100   :  { %v938_v37 = vrot.slane %v937_v7, 2  ;;  %v974_v24 = vadd.f32 %v1652_v38, %v749_v34  ;;  %v611_v25 = vpop.f32.mrf.mxu2 }
 0x101   :  { %v982_v39 = vadd.f32 %v1652_v38, %v813_v35  ;;  %v683_v40 = vpop.f32.mrf.mxu3  ;;  %v875_v41 = vmax.f32 %v873_v33, %v874_v36  ;;  %v470_v43 = vpop.f32.mrf.mxu0 }
 0x102   :  { %v939_v42 = vmax.f32 %v937_v7, %v938_v37  ;;  %v542_v44 = vpop.f32.mrf.mxu1  ;;  %v1043_v45 = vrot.slane %v974_v24, 4  ;;  %v750_v11 = vmax.f32 %v467_v26, %v470_v43 }
 0x103   :  { %v1061_v46 = vrot.slane %v982_v39, 4  ;;  %v876_v47 = vrot.slane %v875_v41, 1  ;;  %v814_v17 = vmax.f32 %v539_v27, %v542_v44 }
 0x104   :  { %v940_v48 = vrot.slane %v939_v42, 1  ;;  %v1711_v49 = vsel %vm1044_vm5, %v1043_v45, %v1042_v58 }
 0x105   :  { %v1714_v50 = vsel %vm1044_vm5, %v1061_v46, %v1060_v59  ;;  %v877_v51 = vmax.f32 %v875_v41, %v876_v47 }
 0x106   :  { %v941_v52 = vmax.f32 %v939_v42, %v940_v48 }
 0x107   :  { %v990_v53 = vadd.f32 %v1652_v38, %v877_v51 }
 0x108   :  { %v998_v54 = vadd.f32 %v1652_v38, %v941_v52  ;;  %v614_v55 = vpop.f32.mrf.mxu2 }
 0x109   :  { %v686_v56 = vpop.f32.mrf.mxu3  ;;  %v1075_v57 = vrot.slane %v990_v53, 4  ;;  %v473_v61 = vpop.f32.mrf.mxu0  ;;  %v878_v32 = vmax.f32 %v611_v25, %v614_v55 }
 0x10a   :  { %v1089_v60 = vrot.slane %v998_v54, 4  ;;  %v545_v62 = vpop.f32.mrf.mxu1  ;;  %v751_v14 = vmax.f32 %v750_v11, %v473_v61  ;;  %v942_v26 = vmax.f32 %v683_v40, %v686_v56 }
 0x10b   :  { %v1719_v63 = vsel %vm1044_vm5, %v1075_v57, %v1074_v1  ;;  %v815_v1 = vmax.f32 %v814_v17, %v545_v62 }
 0x10c   :  { %v1722_v58 = vsel %vm1044_vm5, %v1089_v60, %v1088_v2  ;;  %v752_v18 = vrot.slane %v751_v14, 4 }
 0x10d   :  { %v816_v22 = vrot.slane %v815_v1, 4 }
 0x10e   :  { %v753_v29 = vmax.f32 %v751_v14, %v752_v18 }
 0x10f   :  { %v817_v7 = vmax.f32 %v815_v1, %v816_v22 }
 0x110   :  { %v617_v59 = vpop.f32.mrf.mxu2  ;;  %v754_v36 = vrot.slane %v753_v29, 2 }
 0x111   :  { %v689_v0 = vpop.f32.mrf.mxu3  ;;  %v476_v3 = vpop.f32.mrf.mxu0  ;;  %v879_v34 = vmax.f32 %v878_v32, %v617_v59  ;;  %v818_v43 = vrot.slane %v817_v7, 2 }
 0x112   :  { %v548_v4 = vpop.f32.mrf.mxu1  ;;  %v943_v37 = vmax.f32 %v942_v26, %v689_v0  ;;  %v755_v47 = vmax.f32 %v753_v29, %v754_v36 }
 0x113   :  { %v880_v44 = vrot.slane %v879_v34, 4  ;;  %v819_v55 = vmax.f32 %v817_v7, %v818_v43 }
 0x114   :  { %v944_v48 = vrot.slane %v943_v37, 4  ;;  %v756_v57 = vrot.slane %v755_v47, 1 }
 0x115   :  { %v881_v56 = vmax.f32 %v879_v34, %v880_v44 }
 0x116   :  { %v945_v60 = vmax.f32 %v943_v37, %v944_v48  ;;  %v757_v11 = vmax.f32 %v755_v47, %v756_v57 }
 0x118   :  { %v620_v5 = vpop.f32.mrf.mxu2 }
 0x119   :  { %v692_v8 = vpop.f32.mrf.mxu3  ;;  %v479_v9 = vpop.f32.mrf.mxu0 }
 0x11a   :  { %v551_v10 = vpop.f32.mrf.mxu1  ;;  %v758_v19 = vmax.f32 %v476_v3, %v479_v9  ;;  %v820_v3 = vrot.slane %v819_v55, 1 }
 0x11b   :  { %v822_v2 = vmax.f32 %v548_v4, %v551_v10  ;;  %v882_v4 = vrot.slane %v881_v56, 2 }
 0x120   :  { %v623_v12 = vpop.f32.mrf.mxu2 }
 0x121   :  { %v695_v13 = vpop.f32.mrf.mxu3  ;;  %v482_v15 = vpop.f32.mrf.mxu0  ;;  %v886_v35 = vmax.f32 %v620_v5, %v623_v12  ;;  %v946_v12 = vrot.slane %v945_v60, 2 }
 0x122   :  { %v554_v16 = vpop.f32.mrf.mxu1  ;;  %v759_v20 = vmax.f32 %v758_v19, %v482_v15  ;;  %v950_v27 = vmax.f32 %v692_v8, %v695_v13 }
 0x123   :  { %v823_v21 = vmax.f32 %v822_v2, %v554_v16  ;;  %v821_v2 = vmax.f32 %v819_v55, %v820_v3 }
 0x124   :  { %v760_v6 = vrot.slane %v759_v20, 4 }
 0x125   :  { %v824_v33 = vrot.slane %v823_v21, 4  ;;  %v983_v34 = vadd.f32 %v1652_v38, %v821_v2 }
 0x126   :  { %v761_v41 = vmax.f32 %v759_v20, %v760_v6  ;;  %v883_v20 = vmax.f32 %v881_v56, %v882_v4 }
 0x127   :  { %v825_v42 = vmax.f32 %v823_v21, %v824_v33 }
 0x128   :  { %v626_v23 = vpop.f32.mrf.mxu2  ;;  %v762_v53 = vrot.slane %v761_v41, 2 }
 0x129   :  { %v698_v28 = vpop.f32.mrf.mxu3  ;;  %v485_v30 = vpop.f32.mrf.mxu0  ;;  %v887_v24 = vmax.f32 %v886_v35, %v626_v23  ;;  %v826_v54 = vrot.slane %v825_v42, 2  ;;  %v975_v23 = vadd.f32 %v1652_v38, %v757_v11  ;;  %v884_v35 = vrot.slane %v883_v20, 1 }
 0x12a   :  { %v557_v31 = vpop.f32.mrf.mxu1  ;;  %v951_v39 = vmax.f32 %v950_v27, %v698_v28  ;;  %v763_v59 = vmax.f32 %v761_v41, %v762_v53  ;;  %v947_v28 = vmax.f32 %v945_v60, %v946_v12 }
 0x12b   :  { %v888_v51 = vrot.slane %v887_v24, 4  ;;  %v827_v0 = vmax.f32 %v825_v42, %v826_v54  ;;  %v885_v53 = vmax.f32 %v883_v20, %v884_v35 }
 0x12c   :  { %v952_v52 = vrot.slane %v951_v39, 4  ;;  %v764_v18 = vrot.slane %v763_v59, 1  ;;  %v948_v41 = vrot.slane %v947_v28, 1 }
 0x12d   :  { %v889_v61 = vmax.f32 %v887_v24, %v888_v51  ;;  %v828_v19 = vrot.slane %v827_v0, 1  ;;  %v991_v11 = vadd.f32 %v1652_v38, %v885_v53 }
 0x12e   :  { %v953_v62 = vmax.f32 %v951_v39, %v952_v52  ;;  %v765_v26 = vmax.f32 %v763_v59, %v764_v18  ;;  %v1046_v39 = vrot.slane %v975_v23, 3  ;;  %v1063_v52 = vrot.slane %v983_v34, 3 }
 0x12f   :  { %v890_v15 = vrot.slane %v889_v61, 2  ;;  %v829_v6 = vmax.f32 %v827_v0, %v828_v19  ;;  %v949_v57 = vmax.f32 %v947_v28, %v948_v41  ;;  %v1077_v23 = vrot.slane %v991_v11, 3 }
 0x130   :  { %v629_v45 = vpop.f32.mrf.mxu2  ;;  %v954_v16 = vrot.slane %v953_v62, 2  ;;  %v1048_v56 = vsel %vm1047_vm6, %v1046_v39, %v1711_v49 }
 0x131   :  { %v701_v46 = vpop.f32.mrf.mxu3  ;;  %v488_v25 = vpop.f32.mrf.mxu0  ;;  %v891_v29 = vmax.f32 %v889_v61, %v890_v15 }
 0x132   :  { %v560_v40 = vpop.f32.mrf.mxu1  ;;  %v766_v5 = vmax.f32 %v485_v30, %v488_v25  ;;  %v955_v30 = vmax.f32 %v953_v62, %v954_v16 }
 0x133   :  { %v830_v8 = vmax.f32 %v557_v31, %v560_v40  ;;  %v892_v44 = vrot.slane %v891_v29, 1  ;;  %v976_v40 = vadd.f32 %v1652_v38, %v765_v26 }
 0x134   :  { %v956_v47 = vrot.slane %v955_v30, 1 }
 0x135   :  { %v893_v62 = vmax.f32 %v891_v29, %v892_v44  ;;  %v1049_v4 = vrot.slane %v976_v40, 2 }
 0x136   :  { %v957_v59 = vmax.f32 %v955_v30, %v956_v47 }
 0x137   :  { %v992_v16 = vadd.f32 %v1652_v38, %v893_v62  ;;  %v1051_v19 = vsel %vm1050_vm7, %v1049_v4, %v1048_v56 }
 0x138   :  { %v632_v9 = vpop.f32.mrf.mxu2 }
 0x139   :  { %v704_v10 = vpop.f32.mrf.mxu3  ;;  %v491_v13 = vpop.f32.mrf.mxu0  ;;  %v894_v33 = vmax.f32 %v629_v45, %v632_v9  ;;  %v984_v45 = vadd.f32 %v1652_v38, %v829_v6 }
 0x13a   :  { %v563_v14 = vpop.f32.mrf.mxu1  ;;  %v767_v17 = vmax.f32 %v766_v5, %v491_v13  ;;  %v958_v7 = vmax.f32 %v701_v46, %v704_v10  ;;  %v1064_v10 = vsel %vm1047_vm6, %v1063_v52, %v1714_v50  ;;  %v999_v13 = vadd.f32 %v1652_v38, %v949_v57 }
 0x13b   :  { %v831_v1 = vmax.f32 %v830_v8, %v563_v14  ;;  %v1065_v5 = vrot.slane %v984_v45, 2 }
 0x13c   :  { %v768_v21 = vrot.slane %v767_v17, 4  ;;  %v1091_v28 = vrot.slane %v999_v13, 3 }
 0x13d   :  { %v832_v22 = vrot.slane %v831_v1, 4  ;;  %v1066_v50 = vsel %vm1050_vm7, %v1065_v5, %v1064_v10 }
 0x13e   :  { %v769_v31 = vmax.f32 %v767_v17, %v768_v21  ;;  %v1000_v17 = vadd.f32 %v1652_v38, %v957_v59 }
 0x13f   :  { %v833_v32 = vmax.f32 %v831_v1, %v832_v22 }
 0x140   :  { %v770_v27 = vrot.slane %v769_v31, 2  ;;  %v635_v37 = vpop.f32.mrf.mxu2 }
 0x141   :  { %v834_v36 = vrot.slane %v833_v32, 2  ;;  %v707_v24 = vpop.f32.mrf.mxu3  ;;  %v895_v42 = vmax.f32 %v894_v33, %v635_v37  ;;  %v1078_v33 = vsel %vm1047_vm6, %v1077_v23, %v1719_v63 }
 0x142   :  { %v959_v43 = vmax.f32 %v958_v7, %v707_v24  ;;  %v771_v48 = vmax.f32 %v769_v31, %v770_v27  ;;  %v1079_v31 = vrot.slane %v992_v16, 2  ;;  %v1092_v7 = vsel %vm1047_vm6, %v1091_v28, %v1722_v58 }
 0x143   :  { %v835_v25 = vmax.f32 %v833_v32, %v834_v36  ;;  %v896_v46 = vrot.slane %v895_v42, 4  ;;  %v1093_v32 = vrot.slane %v1000_v17, 2 }
 0x144   :  { %v960_v51 = vrot.slane %v959_v43, 4  ;;  %v772_v54 = vrot.slane %v771_v48, 1  ;;  %v1080_v27 = vsel %vm1050_vm7, %v1079_v31, %v1078_v33 }
 0x145   :  { %v836_v55 = vrot.slane %v835_v25, 1  ;;  %v897_v60 = vmax.f32 %v895_v42, %v896_v46  ;;  %v1094_v36 = vsel %vm1050_vm7, %v1093_v32, %v1092_v7 }
 0x146   :  { %v961_v61 = vmax.f32 %v959_v43, %v960_v51  ;;  %v773_v0 = vmax.f32 %v771_v48, %v772_v54 }
 0x147   :  { %v837_v3 = vmax.f32 %v835_v25, %v836_v55  ;;  %v898_v8 = vrot.slane %v897_v60, 2 }
 0x148   :  { %v962_v9 = vrot.slane %v961_v61, 2  ;;  %v977_v12 = vadd.f32 %v1652_v38, %v773_v0 }
 0x149   :  { %v985_v49 = vadd.f32 %v1652_v38, %v837_v3  ;;  %v899_v14 = vmax.f32 %v897_v60, %v898_v8 }
 0x14a   :  { %v963_v15 = vmax.f32 %v961_v61, %v962_v9  ;;  %v1052_v1 = vrot.slane %v977_v12, 1 }
 0x14b   :  { %v1067_v18 = vrot.slane %v985_v49, 1  ;;  %v900_v2 = vrot.slane %v899_v14, 1 }
 0x14c   :  { %v964_v20 = vrot.slane %v963_v15, 1  ;;  %v1054_v21 = vsel %vm1053_vm8, %v1052_v1, %v1051_v19 }
 0x14d   :  { %v1068_v22 = vsel %vm1053_vm8, %v1067_v18, %v1066_v50  ;;  %1101 = vst [vmem:[#allocation2] sm:$0xff] %v1054_v21  ;;  %v901_v29 = vmax.f32 %v899_v14, %v900_v2 }
 0x14e   :  { %v965_v30 = vmax.f32 %v963_v15, %v964_v20  ;;  %1102 = vst [vmem:[#allocation2 + $0x8] sm:$0xff] %v1068_v22 }
 0x14f   :  { %v993_v26 = vadd.f32 %v1652_v38, %v901_v29 }
 0x150   :  { %v1001_v6 = vadd.f32 %v1652_v38, %v965_v30 }
 0x151   :  { %v1081_v34 = vrot.slane %v993_v26, 1 }
 0x152   :  { %v1095_v35 = vrot.slane %v1001_v6, 1 }
 0x153   :  { %v1082_v38 = vsel %vm1053_vm8, %v1081_v34, %v1080_v27 }
 0x154   :  { %v1096_v37 = vsel %vm1053_vm8, %v1095_v35, %v1094_v36  ;;  %1103 = vst [vmem:[#allocation2 + $0x10] sm:$0xff] %v1082_v38 }
 0x155   :  { %1104 = vst [vmem:[#allocation2 + $0x18] sm:$0xff] %v1096_v37 }
 0x156   :  { %1117 = dma.vmem_to_hbm [thread:$0]  %s1110_s11, 512, %s1112_s14, [#allocation3], %s1254_s3, %s1254_s3, %s1255_s15  }
 0x157   :  { %1251 = dma.done.wait [#allocation3], 512  }
 0x158   :  { %1252 = vsyncadd [#allocation3], 4294966784 }
 0x159   :  { %1122 = vsyncpa [#allocation3], 1 }

</bundles_post_ra>
